<compile_context>
chip_gen: v7x
topology: tpu7x:2x2x1
jax: 0.10.0
libtpu: 0.0.40
codegen_flags: <defaults>
</compile_context>

<pallas_src>
import functools

import jax
import jax.numpy as jnp
from jax.experimental import pallas as pl
from jax.experimental.pallas import tpu as pltpu

_SUBLANES = 8
_LANES = 128
_TARGET_BLOCK_BYTES = 1 << 20  # ~1 MiB of f32 per input block per grid step


def _wmse_kernel(x_ref, t_ref, w_ref, o_ref, acc_ref, *,
                 rows_per_block, blocks_per_split, valid_rows, needs_mask):
    j = pl.program_id(1)

    # Zero the vector accumulator at the start of each split's reduction.
    @pl.when(j == 0)
    def _():
        acc_ref[...] = jnp.zeros_like(acc_ref)

    d = x_ref[...].astype(jnp.float32) - t_ref[...].astype(jnp.float32)
    wd2 = w_ref[...] * d * d          # (rpb, 1) weight broadcasts across lanes

    if needs_mask:
        # Only traced when the row blocking is ragged: mask rows >= valid_rows.
        blk = pl.program_id(0) * blocks_per_split + j
        row0 = blk * rows_per_block
        rows = row0 + jax.lax.broadcasted_iota(jnp.int32, wd2.shape, 0)
        wd2 = jnp.where(rows < valid_rows, wd2, 0.0)

    # Pure elementwise accumulate (VPU only) — no per-step cross-lane reduce.
    acc_ref[...] += wd2

    # Single cross-lane/sublane reduction at the end of this split.
    @pl.when(j == pl.num_programs(1) - 1)
    def _():
        o_ref[...] = jnp.full(o_ref.shape, jnp.sum(acc_ref[...]), jnp.float32)


def weighted_mse_loss(inputs, targets, weights):
    """Pallas TPU implementation of mean(weights * (inputs - targets)**2)."""
    assert inputs.shape == targets.shape and inputs.ndim == 4
    B, C, H, W = inputs.shape
    R, S = B * C, H * W
    total_n = inputs.size  # denominator of torch.mean

    # Per-(batch, channel) weights only — never materialize a full-size array.
    # TODO(synk): weights with spatial (H/W) extent would need a third streamed
    # operand; not supported by this compact fast path.
    w_row = jnp.broadcast_to(jnp.asarray(weights, jnp.float32),
                             (B, C, 1, 1)).reshape(R, 1)

    x2 = inputs.reshape(R, S)   # free reshape (contiguous NCHW)
    t2 = targets.reshape(R, S)

    # Row-block size: ~1 MiB of f32 per input per step, multiple of 8 sublanes.
    r_ceil8 = pl.cdiv(R, _SUBLANES) * _SUBLANES
    target_rows = max(
        _SUBLANES,
        (_TARGET_BLOCK_BYTES // max(S * 4, 1)) // _SUBLANES * _SUBLANES)
    rows_per_block = min(target_rows, r_ceil8)

    nb = pl.cdiv(R, rows_per_block)          # total row blocks
    nsplit = 2 if nb >= 2 else 1             # v7x: one half per TensorCore
    blocks_per_split = pl.cdiv(nb, nsplit)
    needs_mask = (R % rows_per_block != 0) or (nb % nsplit != 0)

    if needs_mask:
        # Clamp so the DMA origin stays inside the array; the masked-out rows
        # contribute zero regardless of what gets read.
        def row_block(i, j):
            return (jnp.minimum(i * blocks_per_split + j, nb - 1), 0)
    else:
        def row_block(i, j):
            return (i * blocks_per_split + j, 0)

    kernel = functools.partial(
        _wmse_kernel,
        rows_per_block=rows_per_block,
        blocks_per_split=blocks_per_split,
        valid_rows=R,
        needs_mask=needs_mask,
    )

    out = pl.pallas_call(
        kernel,
        out_shape=jax.ShapeDtypeStruct((nsplit, _SUBLANES, _LANES), jnp.float32),
        grid_spec=pltpu.PrefetchScalarGridSpec(
            num_scalar_prefetch=0,
            grid=(nsplit, blocks_per_split),
            in_specs=[
                pl.BlockSpec((rows_per_block, S), row_block),
                pl.BlockSpec((rows_per_block, S), row_block),
                pl.BlockSpec((rows_per_block, 1), row_block),
            ],
            out_specs=pl.BlockSpec((1, _SUBLANES, _LANES),
                                   lambda i, j: (i, 0, 0)),
            scratch_shapes=[pltpu.VMEM((rows_per_block, S), jnp.float32)],
        ),
        compiler_params=pltpu.CompilerParams(
            dimension_semantics=("parallel", "arbitrary"),
        ),
    )(x2, t2, w_row)

    # Sum the (at most 2) per-core partials and normalize by the element count.
    return jnp.sum(out[:, 0, 0]) / jnp.float32(total_n)


if __name__ == "__main__":
    key = jax.random.PRNGKey(0)
    k1, k2 = jax.random.split(key)

    B, C, H, W = 2, 4, 16, 16
    inputs = jax.random.normal(k1, (B, C, H, W), dtype=jnp.float32)
    targets = jax.random.normal(k2, (B, C, H, W), dtype=jnp.float32)
    # Deterministic per-channel weights (broadcast over B, H, W), as the
    # module's `weights` constructor argument would supply.
    weights = jnp.asarray([0.5, 1.0, 1.5, 2.0], dtype=jnp.float32).reshape(1, C, 1, 1)

    loss = weighted_mse_loss(inputs, targets, weights)
    jax.block_until_ready(loss)

    # Reference check in plain JAX (mirrors the PyTorch forward exactly).
    ref = jnp.mean(weights * (inputs - targets) ** 2)
    assert jnp.allclose(loss, ref, rtol=1e-5, atol=1e-6), (loss, ref)

    print("KERNEL_OK")
</pallas_src>

<mosaic_0001>
module attributes {stable_mosaic.version = 11 : i64} {
  func.func @_wmse_kernel(%arg0: i32, %arg1: i32, %arg2: memref<8x256xf32, #tpu.memory_space<vmem>>, %arg3: memref<8x256xf32, #tpu.memory_space<vmem>>, %arg4: memref<8x1xf32, #tpu.memory_space<vmem>>, %arg5: memref<1x8x128xf32, #tpu.memory_space<vmem>>, %arg6: memref<8x256xf32, #tpu.memory_space<vmem>>) attributes {dimension_semantics = [#tpu.dimension_semantics<parallel>, #tpu.dimension_semantics<arbitrary>], iteration_bounds = array<i64: 1, 1>, scalar_prefetch = 0 : i64, scratch_operands = 1 : i64, tpu.core_type = #tpu.core_type<tc>, window_params = [{transform_indices = @transform_0, window_bounds = array<i64: 8, 256>}, {transform_indices = @transform_1, window_bounds = array<i64: 8, 256>}, {transform_indices = @transform_2, window_bounds = array<i64: 8, 1>}, {transform_indices = @transform_3, window_bounds = array<i64: 1, 8, 128>}]} {
    %c0_i32 = arith.constant 0 : i32
    %0 = arith.cmpi eq, %arg1, %c0_i32 : i32
    %1 = arith.extui %0 : i1 to i32
    %c0_i32_0 = arith.constant 0 : i32
    %2 = arith.cmpi ne, %1, %c0_i32_0 : i32
    scf.if %2 {
      %cst = arith.constant 0.000000e+00 : f32
      %16 = vector.broadcast %cst : f32 to vector<8x256xf32>
      %c0_12 = arith.constant 0 : index
      %c0_13 = arith.constant 0 : index
      %17 = vector.load %arg6[%c0_12, %c0_13] : memref<8x256xf32, #tpu.memory_space<vmem>>, vector<8x256xf32>
      tpu.vector_store %arg6[%c0_12, %c0_13], %16 {strides = array<i32>} : memref<8x256xf32, #tpu.memory_space<vmem>>, vector<8x256xf32>,
    } else {
    }
    %c0 = arith.constant 0 : index
    %c0_1 = arith.constant 0 : index
    %3 = vector.load %arg2[%c0, %c0_1] : memref<8x256xf32, #tpu.memory_space<vmem>>, vector<8x256xf32>
    %c0_2 = arith.constant 0 : index
    %c0_3 = arith.constant 0 : index
    %4 = vector.load %arg3[%c0_2, %c0_3] : memref<8x256xf32, #tpu.memory_space<vmem>>, vector<8x256xf32>
    %5 = arith.subf %3, %4 : vector<8x256xf32>
    %c0_4 = arith.constant 0 : index
    %c0_5 = arith.constant 0 : index
    %6 = vector.load %arg4[%c0_4, %c0_5] : memref<8x1xf32, #tpu.memory_space<vmem>>, vector<8x1xf32>
    %7 = vector.broadcast %6 : vector<8x1xf32> to vector<8x256xf32>
    %8 = arith.mulf %7, %5 : vector<8x256xf32>
    %9 = arith.mulf %8, %5 : vector<8x256xf32>
    %c0_6 = arith.constant 0 : index
    %c0_7 = arith.constant 0 : index
    %10 = vector.load %arg6[%c0_6, %c0_7] : memref<8x256xf32, #tpu.memory_space<vmem>>, vector<8x256xf32>
    %11 = arith.addf %10, %9 : vector<8x256xf32>
    %c0_8 = arith.constant 0 : index
    %c0_9 = arith.constant 0 : index
    %12 = vector.load %arg6[%c0_8, %c0_9] : memref<8x256xf32, #tpu.memory_space<vmem>>, vector<8x256xf32>
    tpu.vector_store %arg6[%c0_8, %c0_9], %11 {strides = array<i32>} : memref<8x256xf32, #tpu.memory_space<vmem>>, vector<8x256xf32>,
    %c0_i32_10 = arith.constant 0 : i32
    %13 = arith.cmpi eq, %arg1, %c0_i32_10 : i32
    %14 = arith.extui %13 : i1 to i32
    %c0_i32_11 = arith.constant 0 : i32
    %15 = arith.cmpi ne, %14, %c0_i32_11 : i32
    scf.if %15 {
      %c0_12 = arith.constant 0 : index
      %c0_13 = arith.constant 0 : index
      %16 = vector.load %arg6[%c0_12, %c0_13] : memref<8x256xf32, #tpu.memory_space<vmem>>, vector<8x256xf32>
      %17 = vector.shape_cast %16 : vector<8x256xf32> to vector<1x8x256xf32>
      %cst = arith.constant dense<0.000000e+00> : vector<1xf32>
      %18 = vector.multi_reduction <add>, %17, %cst [1, 2] : vector<1x8x256xf32> to vector<1xf32>
      %19 = vector.shape_cast %18 : vector<1xf32> to vector<1x1x1xf32>
      %20 = vector.extract %19[0, 0, 0] : f32 from vector<1x1x1xf32>
      %21 = vector.broadcast %20 : f32 to vector<1x8x128xf32>
      %c0_14 = arith.constant 0 : index
      %c0_15 = arith.constant 0 : index
      %c0_16 = arith.constant 0 : index
      %22 = vector.load %arg5[%c0_14, %c0_15, %c0_16] : memref<1x8x128xf32, #tpu.memory_space<vmem>>, vector<1x8x128xf32>
      tpu.vector_store %arg5[%c0_14, %c0_15, %c0_16], %21 {strides = array<i32>} : memref<1x8x128xf32, #tpu.memory_space<vmem>>, vector<1x8x128xf32>,
    } else {
    }
    return
  }
  func.func @transform_0(%arg0: i32, %arg1: i32) -> (i32, i32) {
    %c1_i32 = arith.constant 1 : i32
    %0 = arith.muli %arg0, %c1_i32 : i32
    %1 = arith.addi %0, %arg1 : i32
    %c0_i32 = arith.constant 0 : i32
    %c0_i32_0 = arith.constant 0 : i32
    return %1, %c0_i32 : i32, i32
  }
  func.func @transform_1(%arg0: i32, %arg1: i32) -> (i32, i32) {
    %c1_i32 = arith.constant 1 : i32
    %0 = arith.muli %arg0, %c1_i32 : i32
    %1 = arith.addi %0, %arg1 : i32
    %c0_i32 = arith.constant 0 : i32
    %c0_i32_0 = arith.constant 0 : i32
    return %1, %c0_i32 : i32, i32
  }
  func.func @transform_2(%arg0: i32, %arg1: i32) -> (i32, i32) {
    %c1_i32 = arith.constant 1 : i32
    %0 = arith.muli %arg0, %c1_i32 : i32
    %1 = arith.addi %0, %arg1 : i32
    %c0_i32 = arith.constant 0 : i32
    %c0_i32_0 = arith.constant 0 : i32
    return %1, %c0_i32 : i32, i32
  }
  func.func @transform_3(%arg0: i32, %arg1: i32) -> (i32, i32, i32) {
    %c0_i32 = arith.constant 0 : i32
    %c0_i32_0 = arith.constant 0 : i32
    %c0_i32_1 = arith.constant 0 : i32
    return %arg0, %c0_i32, %c0_i32_0 : i32, i32, i32
  }
}

</mosaic_0001>

<bundles_post_ra>
// kernel: tpu_custom_call.1
= control target key start
LH: loop header
LB: loop body
LE: loop exit
PB: predicated region body
PF: predicated region fallthrough
CT: control target
= control target key end

     0   :  { %8 = vsyncpa [#allocation4], 0  ;;  %s275_s0 = inlined_call_operand.hbm [shape: f32[8,256], index: 0, kind: input, shape index: {}]   ;;  %s276_s1 = inlined_call_operand.hbm [shape: f32[8,256], index: 1, kind: input, shape index: {}]   ;;  %s277_s2 = inlined_call_operand.vmem [shape: f32[8,1], index: 2, kind: input, shape index: {}]   ;;  %s278_s3 = inlined_call_operand.hbm [shape: f32[1,8,128], index: 3, kind: output, shape index: {}]  }
   0x1   :  { %9 = vsyncpa [#allocation7], 0 }
   0x2   :  { %10 = vsyncpa [#allocation5], 0  ;;  %s212_s12 = smov [#allocation3]   ;;  %s213_s14 = smov [#allocation6]  }
   0x3   :  { %s21_s13 = sshll.u32 %s212_s12, 4  ;;  %s35_s15 = sshll.u32 %s213_s14, 4  ;;  %s22_s13 = int_to_ptr.vmem [resolvable:$true] %s21_s13  ;;  %s36_s15 = int_to_ptr.vmem [resolvable:$true] %s35_s15 }
   0x4   :  { %s140_s18 = scalar_lea.hbm %s275_s0, 256 }
   0x5   :  { %p141_p0 = scmp.ne.s32.totalorder %s275_s0, %s140_s18  ;;  %p144_p1 = scmp.lt.u32.totalorder %s140_s18, %s275_s0 }
   0x7   :  { %p146_p2 = pnand %p144_p1, %p141_p0 }
   0x9   :  { %149 = shalt.err (!%p146_p2)
}
   0xa   :  { %s150_s23 = scalar_lea.vmem %s22_s13, 256  ;;  %p155_p4 = scmp.lt.s32.totalorder %s22_s13, %s22_s13 }
   0xb   :  { %p151_p3 = scmp.ne.s32.totalorder %s22_s13, %s150_s23  ;;  %p156_p5 = scmp.lt.s32.totalorder %s150_s23, %s150_s23 }
   0xd   :  { %p157_p6 = por %p156_p5, %p155_p4 }
   0xf   :  { %p158_p7 = pnand %p157_p6, %p151_p3 }
  0x11   :  { %161 = shalt.err (!%p158_p7)
}
  0x12   :  { %24 = dma.hbm_to_vmem [thread:$0]  %s275_s0, 256, %s22_s13, [#allocation4]  }
  0x13   :  { %s162_s28 = scalar_lea.hbm %s276_s1, 256 }
  0x14   :  { %p163_p8 = scmp.ne.s32.totalorder %s276_s1, %s162_s28  ;;  %p166_p9 = scmp.lt.u32.totalorder %s162_s28, %s276_s1 }
  0x16   :  { %p168_p10 = pnand %p166_p9, %p163_p8 }
  0x18   :  { %171 = shalt.err (!%p168_p10)
}
  0x19   :  { %s172_s6 = scalar_lea.vmem %s36_s15, 256  ;;  %p177_p12 = scmp.lt.s32.totalorder %s36_s15, %s36_s15 }
  0x1a   :  { %p173_p11 = scmp.ne.s32.totalorder %s36_s15, %s172_s6  ;;  %p178_p13 = scmp.lt.s32.totalorder %s172_s6, %s172_s6 }
  0x1c   :  { %p179_p0 = por %p178_p13, %p177_p12 }
  0x1e   :  { %p180_p1 = pnand %p179_p0, %p173_p11 }
  0x20   :  { %183 = shalt.err (!%p180_p1)
}
  0x21   :  { %38 = dma.hbm_to_vmem [thread:$0]  %s276_s1, 256, %s36_s15, [#allocation7]  }
  0x22   :  { %206 = dma.done.wait [#allocation4], 256  }
  0x23   :  { %207 = vsyncadd [#allocation4], 4294967040 }
  0x24   :  { %208 = dma.done.wait [#allocation7], 256  }
  0x25   :  { %209 = vsyncadd [#allocation7], 4294967040  ;;  %v214_v0 = vmov 0   ;;  %v78_v1 = vld [vmem:[%s277_s2] sm:$0xff]  ;;  %v73_v3 = vld [vmem:[#allocation3 + $0x8] sm:$0xff]  ;;  %s215_s1 = smov [#allocation8]  }
  0x26   :  { %139 = vset.pattern.permute.xlu0 %v214_v0  ;;  %v72_v2 = vld [vmem:[#allocation3] sm:$0xff]  ;;  %v74_v4 = vld [vmem:[#allocation6] sm:$0xff]  ;;  %v75_v5 = vld [vmem:[#allocation6 + $0x8] sm:$0xff]  ;;  %s117_s2 = sshll.u32 %s215_s1, 4  ;;  %s118_s2 = int_to_ptr.vmem [resolvable:$true] %s117_s2 }
  0x27   :  { %81 = vperm.xlu0 %139, %v78_v1   ;;  %v76_v6 = vsub.f32 %v72_v2, %v74_v4  ;;  %v77_v7 = vsub.f32 %v73_v3, %v75_v5  ;;  %s184_s11 = scalar_lea.vmem %s118_s2, 128  ;;  %p189_p3 = scmp.lt.s32.totalorder %s118_s2, %s118_s2 }
  0x28   :  { %p185_p2 = scmp.ne.s32.totalorder %s118_s2, %s184_s11  ;;  %p190_p4 = scmp.lt.s32.totalorder %s184_s11, %s184_s11 }
  0x2a   :  { %p191_p5 = por %p190_p4, %p189_p3 }
  0x2c   :  { %p192_p6 = pnand %p191_p5, %p185_p2 }
  0xa6   :  { %v82_v8 = vpop.permute.xlu0 %81 }
  0xa7   :  { %v84_v9 = vmul.f32 %v82_v8, %v76_v6  ;;  %v85_v10 = vmul.f32 %v82_v8, %v77_v7 }
  0xa9   :  { %v86_v11 = vmul.f32 %v84_v9, %v76_v6  ;;  %v87_v12 = vmul.f32 %v85_v10, %v77_v7 }
  0xab   :  { %v99_v13 = vadd.f32 %v87_v12, %v86_v11 }
  0xad   :  { %100 = vadd.xlane.f32.xlu0 %v99_v13 }
 0x13a   :  { %v101_v14 = vpop.xlane.xlu0 %100 }
 0x13b   :  { %v102_v15 = vrot.slane %v101_v14, 4 }
 0x13d   :  { %v103_v16 = vadd.f32 %v102_v15, %v101_v14 }
 0x13f   :  { %v104_v17 = vrot.slane %v103_v16, 2 }
 0x141   :  { %v105_v18 = vadd.f32 %v104_v17, %v103_v16 }
 0x143   :  { %v106_v19 = vrot.slane %v105_v18, 1 }
 0x145   :  { %v107_v20 = vadd.f32 %v106_v19, %v105_v18 }
 0x147   :  { %133 = vpush %v107_v20 }
 0x178   :  { %s134_s10 = spop %133 }
 0x179   :  { %v109_v21 = vstv %s134_s10 }
 0x17a   :  { %110 = vst [vmem:[#allocation8] sm:$0xff] %v109_v21 }
 0x17b   :  { %195 = shalt.err (!%p192_p6)
}
 0x17c   :  { %s196_s14 = scalar_lea.hbm %s278_s3, 128 }
 0x17d   :  { %p197_p7 = scmp.ne.s32.totalorder %s278_s3, %s196_s14  ;;  %p200_p8 = scmp.lt.u32.totalorder %s196_s14, %s278_s3 }
 0x17f   :  { %p202_p9 = pnand %p200_p8, %p197_p7 }
 0x181   :  { %205 = shalt.err (!%p202_p9)
}
 0x182   :  { %120 = dma.vmem_to_hbm [thread:$0]  %s118_s2, 128, %s278_s3, [#allocation5]  }
 0x183   :  { %210 = dma.done.wait [#allocation5], 128  }
 0x184   :  { %211 = vsyncadd [#allocation5], 4294967168 }
 0x185   :  { %124 = vsyncpa [#allocation4], 1 }
 0x186   :  { %125 = vsyncpa [#allocation7], 1 }
 0x187   :  { %126 = vsyncpa [#allocation5], 1 }

</bundles_post_ra>
